<compile_context>
chip_gen: v7x
topology: tpu7x:2x2x1
jax: 0.10.0
libtpu: 0.0.40
codegen_flags: <defaults>
</compile_context>

<pallas_src>
import functools

import jax
import jax.numpy as jnp
from jax.experimental import pallas as pl
from jax.experimental.pallas import tpu as pltpu


def get_same_padding(kernel_size: int, stride: int, dilation: int) -> int:
    if stride > 1 and dilation > 1:
        raise ValueError("Only stride OR dilation may be greater than 1")
    return dilation * (kernel_size - 1) // 2


def _round_up(x: int, m: int) -> int:
    return ((x + m - 1) // m) * m


# ----------------------------------------------------------------------------
# Pass 1: Conv1d (stride=1) + bias + ReLU, plus per-channel sum / sumsq.
# ----------------------------------------------------------------------------
def _conv_relu_stats_kernel(x_ref, xnext_ref, w_ref, b_ref,
                            y_ref, sum_ref, sq_ref,
                            *, kernel_size: int, dilation: int,
                            l_tile: int, l_valid: int):
    """One (batch, L-tile) step.

    x_ref:     (1, C_in, T)        f32   current tile of padded input
    xnext_ref: (1, C_in, T)        f32   next tile (supplies the conv halo)
    w_ref:     (C_out, K * C_in)   bf16  flattened conv weight
    b_ref:     (C_out, 1)          f32   conv bias
    y_ref:     (1, C_out, T)       f32   conv+ReLU output tile
    sum_ref:   (1, C_out, 1)       f32   per-channel sum   (resident over L)
    sq_ref:    (1, C_out, 1)       f32   per-channel sumsq (resident over L)
    """
    j = pl.program_id(1)
    T = l_tile
    xm = x_ref[0]        # (C_in, T)
    xn = xnext_ref[0]    # (C_in, T)
    c_in = xm.shape[0]

    lane = jax.lax.broadcasted_iota(jnp.int32, (1, T), 1)

    # Build the K dilation-shifted views of the tile. For shift s, columns
    # [s, T) come from this tile and columns [T, T+s) from the next tile:
    #   piece[i] = xm[i+s]            for i <  T - s
    #            = xn[i+s-T]          for i >= T - s
    # Both branches are a circular roll by (T - s) -> XLU work, stays in vregs.
    pieces = []
    for k in range(kernel_size):
        s = k * dilation
        if s == 0:
            pieces.append(xm)
        else:
            rolled_m = pltpu.roll(xm, shift=T - s, axis=1)
            rolled_n = pltpu.roll(xn, shift=T - s, axis=1)
            pieces.append(jnp.where(lane < (T - s), rolled_m, rolled_n))

    # Collapse the K taps into one MXU matmul when the stacked operand is
    # sublane-aligned; otherwise fall back to K dots accumulated in vregs.
    # (At tiny channel counts the MXU is underfilled either way; the win is
    #  fewer push/pops and it scales to production channel counts.)
    if kernel_size == 1 or (c_in % 8 == 0):
        x_stack = pieces[0] if kernel_size == 1 else jnp.concatenate(pieces, axis=0)
        acc = jnp.dot(w_ref[...], x_stack.astype(jnp.bfloat16),
                      preferred_element_type=jnp.float32)
    else:
        acc = None
        for k, piece in enumerate(pieces):
            w_k = w_ref[:, k * c_in:(k + 1) * c_in]
            d = jnp.dot(w_k, piece.astype(jnp.bfloat16),
                        preferred_element_type=jnp.float32)
            acc = d if acc is None else acc + d

    # bias + ReLU in f32, single lane-dense store of the tile.
    y = jnp.maximum(acc + b_ref[...], 0.0)            # (C_out, T)
    y_ref[0] = y

    # Single-pass BN statistics over the valid (un-padded) columns only.
    col = j * T + lane                                  # (1, T) global column
    valid = col < l_valid
    ym = jnp.where(valid, y, 0.0)
    s_sum = jnp.sum(ym, axis=1, keepdims=True)          # (C_out, 1)
    s_sq = jnp.sum(ym * ym, axis=1, keepdims=True)      # (C_out, 1)

    @pl.when(j == 0)
    def _init():
        sum_ref[0] = s_sum
        sq_ref[0] = s_sq

    @pl.when(j > 0)
    def _accum():
        sum_ref[0] = sum_ref[0] + s_sum
        sq_ref[0] = sq_ref[0] + s_sq


# ----------------------------------------------------------------------------
# Pass 2: BatchNorm applied as a fused per-channel scale + shift.
# ----------------------------------------------------------------------------
def _bn_apply_kernel(y_ref, scale_ref, shift_ref, o_ref):
    # y_ref/o_ref: (1, C_out, T); scale/shift: (C_out, 1)
    o_ref[0] = y_ref[0] * scale_ref[...] + shift_ref[...]


# ----------------------------------------------------------------------------
# Wrapper
# ----------------------------------------------------------------------------
@functools.partial(
    jax.jit,
    static_argnames=("kernel_size", "dilation", "stride", "padding", "eps",
                     "max_l_tile"))
def tdnn_forward(x, weight, bias, gamma, beta, *, kernel_size, dilation=1,
                 stride=1, padding=None, eps=1e-5, max_l_tile=512):
    """x: (N, C_in, L) f32; weight: (C_out, C_in, K). Returns (N, C_out, L_out)."""
    if stride != 1:
        # TODO(synk): stride > 1 not implemented (TDNNModule default is stride=1).
        raise NotImplementedError("stride > 1 not supported by this Pallas kernel")
    if padding is None:
        padding = get_same_padding(kernel_size, stride=stride, dilation=dilation)

    N, C_in, L = x.shape
    C_out = weight.shape[0]
    K = kernel_size
    halo = dilation * (K - 1)
    L_out = L + 2 * padding - halo
    assert L_out >= 1

    # Lane-dense tile (multiple of 128), capped so double-buffered blocks fit
    # comfortably inside v7x's 32 MiB scoped VMEM as well as v5e/v6e.
    T = min(max_l_tile, _round_up(L_out, 128))
    assert halo <= T, "conv halo must fit inside one L tile"
    num_tiles = pl.cdiv(L_out, T)
    LT = num_tiles * T
    Lx = (num_tiles + 1) * T          # extra trailing tile feeds the halo fetch

    x_p = jnp.pad(x.astype(jnp.float32),
                  ((0, 0), (0, 0), (padding, Lx - padding - L)))
    # (C_out, C_in, K) -> (C_out, K*C_in), bf16 for the MXU.
    w_flat = jnp.transpose(weight, (0, 2, 1)).reshape(C_out, K * C_in)
    w_flat = w_flat.astype(jnp.bfloat16)
    b2 = bias.reshape(C_out, 1).astype(jnp.float32)

    kernel1 = functools.partial(_conv_relu_stats_kernel, kernel_size=K,
                                dilation=dilation, l_tile=T, l_valid=L_out)
    cparams = pltpu.CompilerParams(
        dimension_semantics=("parallel", "arbitrary"),
        vmem_limit_bytes=32 * 1024 * 1024,
    )
    y, s_sum, s_sq = pl.pallas_call(
        kernel1,
        grid=(N, num_tiles),
        in_specs=[
            pl.BlockSpec((1, C_in, T), lambda n, j: (n, 0, j)),       # tile
            pl.BlockSpec((1, C_in, T), lambda n, j: (n, 0, j + 1)),   # halo
            pl.BlockSpec((C_out, K * C_in), lambda n, j: (0, 0)),     # weights
            pl.BlockSpec((C_out, 1), lambda n, j: (0, 0)),            # bias
        ],
        out_specs=(
            pl.BlockSpec((1, C_out, T), lambda n, j: (n, 0, j)),
            pl.BlockSpec((1, C_out, 1), lambda n, j: (n, 0, 0)),
            pl.BlockSpec((1, C_out, 1), lambda n, j: (n, 0, 0)),
        ),
        out_shape=(
            jax.ShapeDtypeStruct((N, C_out, LT), jnp.float32),
            jax.ShapeDtypeStruct((N, C_out, 1), jnp.float32),
            jax.ShapeDtypeStruct((N, C_out, 1), jnp.float32),
        ),
        compiler_params=cparams,
    )(x_p, x_p, w_flat, b2)

    # Tiny per-channel BN math (training-mode batch stats, biased variance).
    count = float(N * L_out)
    mean = jnp.sum(s_sum, axis=0) / count                          # (C_out, 1)
    var = jnp.maximum(jnp.sum(s_sq, axis=0) / count - mean * mean, 0.0)
    scale = gamma.reshape(C_out, 1).astype(jnp.float32) * jax.lax.rsqrt(var + eps)
    shift = beta.reshape(C_out, 1).astype(jnp.float32) - mean * scale

    out = pl.pallas_call(
        _bn_apply_kernel,
        grid=(N, num_tiles),
        in_specs=[
            pl.BlockSpec((1, C_out, T), lambda n, j: (n, 0, j)),
            pl.BlockSpec((C_out, 1), lambda n, j: (0, 0)),
            pl.BlockSpec((C_out, 1), lambda n, j: (0, 0)),
        ],
        out_specs=pl.BlockSpec((1, C_out, T), lambda n, j: (n, 0, j)),
        out_shape=jax.ShapeDtypeStruct((N, C_out, LT), jnp.float32),
        compiler_params=pltpu.CompilerParams(
            dimension_semantics=("parallel", "parallel"),
            vmem_limit_bytes=32 * 1024 * 1024,
        ),
    )(y, scale, shift)

    return out[:, :, :L_out]


# ----------------------------------------------------------------------------
# Pure-JAX reference (Conv1d -> ReLU -> BatchNorm1d in training mode).
# ----------------------------------------------------------------------------
def tdnn_reference(x, weight, bias, gamma, beta, *, kernel_size, dilation=1,
                   padding=None, eps=1e-5, conv_dtype=jnp.float32):
    if padding is None:
        padding = get_same_padding(kernel_size, stride=1, dilation=dilation)
    y = jax.lax.conv_general_dilated(
        x.astype(conv_dtype), weight.astype(conv_dtype),
        window_strides=(1,), padding=[(padding, padding)],
        rhs_dilation=(dilation,), dimension_numbers=("NCH", "OIH", "NCH"),
        preferred_element_type=jnp.float32,
    ) + bias[None, :, None]
    y = jnp.maximum(y, 0.0)
    mean = jnp.mean(y, axis=(0, 2), keepdims=True)
    var = jnp.mean((y - mean) ** 2, axis=(0, 2), keepdims=True)
    return gamma[None, :, None] * (y - mean) * jax.lax.rsqrt(var + eps) \
        + beta[None, :, None]


if __name__ == "__main__":
    # Shapes consistent with TDNNModule(inp_filters=8, out_filters=16, kernel_size=3)
    N, C_in, C_out, L, K, dil = 2, 8, 16, 16, 3, 1

    key = jax.random.PRNGKey(0)
    kx, kw, kb, kg, kbt = jax.random.split(key, 5)
    x = jax.random.normal(kx, (N, C_in, L), dtype=jnp.float32)
    fan_in = C_in * K
    weight = jax.random.normal(kw, (C_out, C_in, K), dtype=jnp.float32) / jnp.sqrt(fan_in)
    bias = jax.random.normal(kb, (C_out,), dtype=jnp.float32) * 0.1
    gamma = 1.0 + 0.1 * jax.random.normal(kg, (C_out,), dtype=jnp.float32)
    beta = 0.1 * jax.random.normal(kbt, (C_out,), dtype=jnp.float32)

    out = tdnn_forward(x, weight, bias, gamma, beta, kernel_size=K, dilation=dil)
    out = jax.block_until_ready(out)
    assert out.shape == (N, C_out, L), out.shape

    # Primary check: reference that mirrors the kernel's deliberate bf16 MXU
    # inputs (f32 accumulation), so any structural/indexing bug shows up.
    ref_bf16 = tdnn_reference(x, weight, bias, gamma, beta, kernel_size=K,
                              dilation=dil, conv_dtype=jnp.bfloat16)
    err = float(jnp.max(jnp.abs(out - ref_bf16)))
    assert jnp.allclose(out, ref_bf16, atol=2e-3, rtol=2e-3), err

    # Sanity check vs. the full-f32 module semantics (gap is only the bf16
    # matmul-input precision choice).
    ref_f32 = tdnn_reference(x, weight, bias, gamma, beta, kernel_size=K,
                             dilation=dil, conv_dtype=jnp.float32)
    err32 = float(jnp.max(jnp.abs(out - ref_f32)))
    assert jnp.allclose(out, ref_f32, atol=1e-1, rtol=1e-1), err32

    # Second config: dilation=2 and a longer sequence with a small tile cap to
    # exercise multiple L tiles, cross-tile halos and masked statistics.
    L2, K2, dil2 = 300, 3, 2
    x2 = jax.random.normal(kx, (N, C_in, L2), dtype=jnp.float32)
    w2 = jax.random.normal(kw, (C_out, C_in, K2), dtype=jnp.float32) / jnp.sqrt(C_in * K2)
    out2 = tdnn_forward(x2, w2, bias, gamma, beta, kernel_size=K2,
                        dilation=dil2, max_l_tile=128)
    out2 = jax.block_until_ready(out2)
    ref2 = tdnn_reference(x2, w2, bias, gamma, beta, kernel_size=K2,
                          dilation=dil2, conv_dtype=jnp.bfloat16)
    assert out2.shape == ref2.shape, (out2.shape, ref2.shape)
    err2 = float(jnp.max(jnp.abs(out2 - ref2)))
    assert jnp.allclose(out2, ref2, atol=2e-3, rtol=2e-3), err2

    print("KERNEL_OK")
</pallas_src>

<mosaic_0001>
module attributes {stable_mosaic.version = 11 : i64} {
  func.func @_bn_apply_kernel(%arg0: i32, %arg1: i32, %arg2: memref<1x16x128xf32, #tpu.memory_space<vmem>>, %arg3: memref<16x1xf32, #tpu.memory_space<vmem>>, %arg4: memref<16x1xf32, #tpu.memory_space<vmem>>, %arg5: memref<1x16x128xf32, #tpu.memory_space<vmem>>) attributes {dimension_semantics = [#tpu.dimension_semantics<parallel>, #tpu.dimension_semantics<parallel>], iteration_bounds = array<i64: 2, 1>, scalar_prefetch = 0 : i64, scratch_operands = 0 : i64, tpu.core_type = #tpu.core_type<tc>, window_params = [{transform_indices = @transform_0, window_bounds = array<i64: 1, 16, 128>}, {pipeline_mode = #tpu.pipeline_mode<synchronous>, transform_indices = @transform_1, window_bounds = array<i64: 16, 1>}, {pipeline_mode = #tpu.pipeline_mode<synchronous>, transform_indices = @transform_2, window_bounds = array<i64: 16, 1>}, {transform_indices = @transform_3, window_bounds = array<i64: 1, 16, 128>}]} {
    %c0 = arith.constant 0 : index
    %c0_0 = arith.constant 0 : index
    %c0_1 = arith.constant 0 : index
    %0 = vector.load %arg2[%c0, %c0_0, %c0_1] : memref<1x16x128xf32, #tpu.memory_space<vmem>>, vector<1x16x128xf32>
    %1 = vector.shape_cast %0 : vector<1x16x128xf32> to vector<16x128xf32>
    %c0_2 = arith.constant 0 : index
    %c0_3 = arith.constant 0 : index
    %2 = vector.load %arg3[%c0_2, %c0_3] : memref<16x1xf32, #tpu.memory_space<vmem>>, vector<16x1xf32>
    %3 = vector.broadcast %2 : vector<16x1xf32> to vector<16x128xf32>
    %4 = arith.mulf %1, %3 : vector<16x128xf32>
    %c0_4 = arith.constant 0 : index
    %c0_5 = arith.constant 0 : index
    %5 = vector.load %arg4[%c0_4, %c0_5] : memref<16x1xf32, #tpu.memory_space<vmem>>, vector<16x1xf32>
    %6 = vector.broadcast %5 : vector<16x1xf32> to vector<16x128xf32>
    %7 = arith.addf %4, %6 : vector<16x128xf32>
    %c0_6 = arith.constant 0 : index
    %c0_7 = arith.constant 0 : index
    %c0_8 = arith.constant 0 : index
    %8 = vector.load %arg5[%c0_6, %c0_7, %c0_8] : memref<1x16x128xf32, #tpu.memory_space<vmem>>, vector<1x16x128xf32>
    %9 = vector.shape_cast %8 : vector<1x16x128xf32> to vector<16x128xf32>
    %10 = vector.shape_cast %7 : vector<16x128xf32> to vector<1x16x128xf32>
    tpu.vector_store %arg5[%c0_6, %c0_7, %c0_8], %10 {strides = array<i32>} : memref<1x16x128xf32, #tpu.memory_space<vmem>>, vector<1x16x128xf32>,
    return
  }
  func.func @transform_0(%arg0: i32, %arg1: i32) -> (i32, i32, i32) {
    %c0_i32 = arith.constant 0 : i32
    %c0_i32_0 = arith.constant 0 : i32
    return %arg0, %c0_i32, %arg1 : i32, i32, i32
  }
  func.func @transform_1(%arg0: i32, %arg1: i32) -> (i32, i32) {
    %c0_i32 = arith.constant 0 : i32
    %c0_i32_0 = arith.constant 0 : i32
    %c0_i32_1 = arith.constant 0 : i32
    return %c0_i32, %c0_i32_0 : i32, i32
  }
  func.func @transform_2(%arg0: i32, %arg1: i32) -> (i32, i32) {
    %c0_i32 = arith.constant 0 : i32
    %c0_i32_0 = arith.constant 0 : i32
    %c0_i32_1 = arith.constant 0 : i32
    return %c0_i32, %c0_i32_0 : i32, i32
  }
  func.func @transform_3(%arg0: i32, %arg1: i32) -> (i32, i32, i32) {
    %c0_i32 = arith.constant 0 : i32
    %c0_i32_0 = arith.constant 0 : i32
    return %arg0, %c0_i32, %arg1 : i32, i32, i32
  }
}

module attributes {stable_mosaic.version = 11 : i64} {
  func.func @_conv_relu_stats_kernel(%arg0: i32, %arg1: i32, %arg2: memref<1x8x128xf32, #tpu.memory_space<vmem>>, %arg3: memref<1x8x128xf32, #tpu.memory_space<vmem>>, %arg4: memref<16x24xbf16, #tpu.memory_space<vmem>>, %arg5: memref<16x1xf32, #tpu.memory_space<vmem>>, %arg6: memref<1x16x128xf32, #tpu.memory_space<vmem>>, %arg7: memref<1x16x1xf32, #tpu.memory_space<vmem>>, %arg8: memref<1x16x1xf32, #tpu.memory_space<vmem>>) attributes {dimension_semantics = [#tpu.dimension_semantics<parallel>, #tpu.dimension_semantics<arbitrary>], iteration_bounds = array<i64: 2, 1>, scalar_prefetch = 0 : i64, scratch_operands = 0 : i64, tpu.core_type = #tpu.core_type<tc>, window_params = [{transform_indices = @transform_0, window_bounds = array<i64: 1, 8, 128>}, {transform_indices = @transform_1, window_bounds = array<i64: 1, 8, 128>}, {pipeline_mode = #tpu.pipeline_mode<synchronous>, transform_indices = @transform_2, window_bounds = array<i64: 16, 24>}, {pipeline_mode = #tpu.pipeline_mode<synchronous>, transform_indices = @transform_3, window_bounds = array<i64: 16, 1>}, {transform_indices = @transform_4, window_bounds = array<i64: 1, 16, 128>}, {transform_indices = @transform_5, window_bounds = array<i64: 1, 16, 1>}, {transform_indices = @transform_6, window_bounds = array<i64: 1, 16, 1>}]} {
    %c0 = arith.constant 0 : index
    %c0_0 = arith.constant 0 : index
    %c0_1 = arith.constant 0 : index
    %0 = vector.load %arg2[%c0, %c0_0, %c0_1] : memref<1x8x128xf32, #tpu.memory_space<vmem>>, vector<1x8x128xf32>
    %1 = vector.shape_cast %0 : vector<1x8x128xf32> to vector<8x128xf32>
    %c0_2 = arith.constant 0 : index
    %c0_3 = arith.constant 0 : index
    %c0_4 = arith.constant 0 : index
    %2 = vector.load %arg3[%c0_2, %c0_3, %c0_4] : memref<1x8x128xf32, #tpu.memory_space<vmem>>, vector<1x8x128xf32>
    %3 = vector.shape_cast %2 : vector<1x8x128xf32> to vector<8x128xf32>
    %4 = tpu.iota {dimensions = array<i32: 1>} : vector<1x128xi32>
    %c127_i32 = arith.constant 127 : i32
    %5 = tpu.dynamic_rotate %1 by %c127_i32 dim 1 : vector<8x128xf32>, i32 -> vector<8x128xf32>
    %c127_i32_5 = arith.constant 127 : i32
    %6 = tpu.dynamic_rotate %3 by %c127_i32_5 dim 1 : vector<8x128xf32>, i32 -> vector<8x128xf32>
    %c127_i32_6 = arith.constant 127 : i32
    %7 = vector.broadcast %c127_i32_6 : i32 to vector<1x128xi32>
    %8 = arith.cmpi slt, %4, %7 : vector<1x128xi32>
    %9 = vector.shape_cast %8 : vector<1x128xi1> to vector<1x128xi1>
    %10 = vector.broadcast %9 : vector<1x128xi1> to vector<8x128xi1>
    %11 = arith.select %10, %5, %6 : vector<8x128xi1>, vector<8x128xf32>
    %c126_i32 = arith.constant 126 : i32
    %12 = tpu.dynamic_rotate %1 by %c126_i32 dim 1 : vector<8x128xf32>, i32 -> vector<8x128xf32>
    %c126_i32_7 = arith.constant 126 : i32
    %13 = tpu.dynamic_rotate %3 by %c126_i32_7 dim 1 : vector<8x128xf32>, i32 -> vector<8x128xf32>
    %c126_i32_8 = arith.constant 126 : i32
    %14 = vector.broadcast %c126_i32_8 : i32 to vector<1x128xi32>
    %15 = arith.cmpi slt, %4, %14 : vector<1x128xi32>
    %16 = vector.shape_cast %15 : vector<1x128xi1> to vector<1x128xi1>
    %17 = vector.broadcast %16 : vector<1x128xi1> to vector<8x128xi1>
    %18 = arith.select %17, %12, %13 : vector<8x128xi1>, vector<8x128xf32>
    %19 = tpu.concatenate %1, %11, %18 in 0 : vector<8x128xf32>, vector<8x128xf32>, vector<8x128xf32> -> vector<24x128xf32>
    %c0_9 = arith.constant 0 : index
    %c0_10 = arith.constant 0 : index
    %20 = vector.load %arg4[%c0_9, %c0_10] : memref<16x24xbf16, #tpu.memory_space<vmem>>, vector<16x24xbf16>
    %21 = arith.truncf %19 : vector<24x128xf32> to vector<24x128xbf16>
    %cst = arith.constant dense<0.000000e+00> : vector<16x128xf32>
    %22 = tpu.matmul %20, %21, %cst {dimension_numbers = #tpu.dot_dimension_numbers<[1], [0], [0], [1], [0, 0, 1, 1], [], []>} : vector<16x24xbf16>, vector<24x128xbf16>, vector<16x128xf32> -> vector<16x128xf32>
    %c0_11 = arith.constant 0 : index
    %c0_12 = arith.constant 0 : index
    %23 = vector.load %arg5[%c0_11, %c0_12] : memref<16x1xf32, #tpu.memory_space<vmem>>, vector<16x1xf32>
    %24 = vector.broadcast %23 : vector<16x1xf32> to vector<16x128xf32>
    %25 = arith.addf %22, %24 : vector<16x128xf32>
    %cst_13 = arith.constant 0.000000e+00 : f32
    %26 = vector.broadcast %cst_13 : f32 to vector<16x128xf32>
    %27 = arith.maximumf %25, %26 : vector<16x128xf32>
    %c0_14 = arith.constant 0 : index
    %c0_15 = arith.constant 0 : index
    %c0_16 = arith.constant 0 : index
    %28 = vector.load %arg6[%c0_14, %c0_15, %c0_16] : memref<1x16x128xf32, #tpu.memory_space<vmem>>, vector<1x16x128xf32>
    %29 = vector.shape_cast %28 : vector<1x16x128xf32> to vector<16x128xf32>
    %30 = vector.shape_cast %27 : vector<16x128xf32> to vector<1x16x128xf32>
    tpu.vector_store %arg6[%c0_14, %c0_15, %c0_16], %30 {strides = array<i32>} : memref<1x16x128xf32, #tpu.memory_space<vmem>>, vector<1x16x128xf32>,
    %c128_i32 = arith.constant 128 : i32
    %31 = arith.muli %arg1, %c128_i32 : i32
    %32 = vector.broadcast %31 : i32 to vector<1x128xi32>
    %33 = arith.addi %32, %4 : vector<1x128xi32>
    %c16_i32 = arith.constant 16 : i32
    %34 = vector.broadcast %c16_i32 : i32 to vector<1x128xi32>
    %35 = arith.cmpi slt, %33, %34 : vector<1x128xi32>
    %cst_17 = arith.constant 0.000000e+00 : f32
    %36 = vector.shape_cast %35 : vector<1x128xi1> to vector<1x128xi1>
    %37 = vector.broadcast %36 : vector<1x128xi1> to vector<16x128xi1>
    %38 = vector.broadcast %cst_17 : f32 to vector<16x128xf32>
    %39 = arith.select %37, %27, %38 : vector<16x128xi1>, vector<16x128xf32>
    %cst_18 = arith.constant dense<0.000000e+00> : vector<16xf32>
    %40 = vector.multi_reduction <add>, %39, %cst_18 [1] : vector<16x128xf32> to vector<16xf32>
    %41 = vector.shape_cast %40 : vector<16xf32> to vector<16x1xf32>
    %42 = arith.mulf %39, %39 : vector<16x128xf32>
    %cst_19 = arith.constant dense<0.000000e+00> : vector<16xf32>
    %43 = vector.multi_reduction <add>, %42, %cst_19 [1] : vector<16x128xf32> to vector<16xf32>
    %44 = vector.shape_cast %43 : vector<16xf32> to vector<16x1xf32>
    %c0_i32 = arith.constant 0 : i32
    %45 = arith.cmpi eq, %arg1, %c0_i32 : i32
    %46 = arith.extui %45 : i1 to i32
    %c0_i32_20 = arith.constant 0 : i32
    %47 = arith.cmpi ne, %46, %c0_i32_20 : i32
    scf.if %47 {
      %c0_23 = arith.constant 0 : index
      %c0_24 = arith.constant 0 : index
      %c0_25 = arith.constant 0 : index
      %51 = vector.load %arg7[%c0_23, %c0_24, %c0_25] : memref<1x16x1xf32, #tpu.memory_space<vmem>>, vector<1x16x1xf32>
      %52 = vector.shape_cast %51 : vector<1x16x1xf32> to vector<16x1xf32>
      %53 = vector.shape_cast %41 : vector<16x1xf32> to vector<1x16x1xf32>
      tpu.vector_store %arg7[%c0_23, %c0_24, %c0_25], %53 {strides = array<i32>} : memref<1x16x1xf32, #tpu.memory_space<vmem>>, vector<1x16x1xf32>,
      %c0_26 = arith.constant 0 : index
      %c0_27 = arith.constant 0 : index
      %c0_28 = arith.constant 0 : index
      %54 = vector.load %arg8[%c0_26, %c0_27, %c0_28] : memref<1x16x1xf32, #tpu.memory_space<vmem>>, vector<1x16x1xf32>
      %55 = vector.shape_cast %54 : vector<1x16x1xf32> to vector<16x1xf32>
      %56 = vector.shape_cast %44 : vector<16x1xf32> to vector<1x16x1xf32>
      tpu.vector_store %arg8[%c0_26, %c0_27, %c0_28], %56 {strides = array<i32>} : memref<1x16x1xf32, #tpu.memory_space<vmem>>, vector<1x16x1xf32>,
    } else {
    }
    %c0_i32_21 = arith.constant 0 : i32
    %48 = arith.cmpi sgt, %arg1, %c0_i32_21 : i32
    %49 = arith.extui %48 : i1 to i32
    %c0_i32_22 = arith.constant 0 : i32
    %50 = arith.cmpi ne, %49, %c0_i32_22 : i32
    scf.if %50 {
      %c0_23 = arith.constant 0 : index
      %c0_24 = arith.constant 0 : index
      %c0_25 = arith.constant 0 : index
      %51 = vector.load %arg7[%c0_23, %c0_24, %c0_25] : memref<1x16x1xf32, #tpu.memory_space<vmem>>, vector<1x16x1xf32>
      %52 = vector.shape_cast %51 : vector<1x16x1xf32> to vector<16x1xf32>
      %53 = arith.addf %52, %41 : vector<16x1xf32>
      %c0_26 = arith.constant 0 : index
      %c0_27 = arith.constant 0 : index
      %c0_28 = arith.constant 0 : index
      %54 = vector.load %arg7[%c0_26, %c0_27, %c0_28] : memref<1x16x1xf32, #tpu.memory_space<vmem>>, vector<1x16x1xf32>
      %55 = vector.shape_cast %54 : vector<1x16x1xf32> to vector<16x1xf32>
      %56 = vector.shape_cast %53 : vector<16x1xf32> to vector<1x16x1xf32>
      tpu.vector_store %arg7[%c0_26, %c0_27, %c0_28], %56 {strides = array<i32>} : memref<1x16x1xf32, #tpu.memory_space<vmem>>, vector<1x16x1xf32>,
      %c0_29 = arith.constant 0 : index
      %c0_30 = arith.constant 0 : index
      %c0_31 = arith.constant 0 : index
      %57 = vector.load %arg8[%c0_29, %c0_30, %c0_31] : memref<1x16x1xf32, #tpu.memory_space<vmem>>, vector<1x16x1xf32>
      %58 = vector.shape_cast %57 : vector<1x16x1xf32> to vector<16x1xf32>
      %59 = arith.addf %58, %44 : vector<16x1xf32>
      %c0_32 = arith.constant 0 : index
      %c0_33 = arith.constant 0 : index
      %c0_34 = arith.constant 0 : index
      %60 = vector.load %arg8[%c0_32, %c0_33, %c0_34] : memref<1x16x1xf32, #tpu.memory_space<vmem>>, vector<1x16x1xf32>
      %61 = vector.shape_cast %60 : vector<1x16x1xf32> to vector<16x1xf32>
      %62 = vector.shape_cast %59 : vector<16x1xf32> to vector<1x16x1xf32>
      tpu.vector_store %arg8[%c0_32, %c0_33, %c0_34], %62 {strides = array<i32>} : memref<1x16x1xf32, #tpu.memory_space<vmem>>, vector<1x16x1xf32>,
    } else {
    }
    return
  }
  func.func @transform_0(%arg0: i32, %arg1: i32) -> (i32, i32, i32) {
    %c0_i32 = arith.constant 0 : i32
    %c0_i32_0 = arith.constant 0 : i32
    return %arg0, %c0_i32, %arg1 : i32, i32, i32
  }
  func.func @transform_1(%arg0: i32, %arg1: i32) -> (i32, i32, i32) {
    %c1_i32 = arith.constant 1 : i32
    %0 = arith.addi %arg1, %c1_i32 : i32
    %c0_i32 = arith.constant 0 : i32
    %c0_i32_0 = arith.constant 0 : i32
    return %arg0, %c0_i32, %0 : i32, i32, i32
  }
  func.func @transform_2(%arg0: i32, %arg1: i32) -> (i32, i32) {
    %c0_i32 = arith.constant 0 : i32
    %c0_i32_0 = arith.constant 0 : i32
    %c0_i32_1 = arith.constant 0 : i32
    return %c0_i32, %c0_i32_0 : i32, i32
  }
  func.func @transform_3(%arg0: i32, %arg1: i32) -> (i32, i32) {
    %c0_i32 = arith.constant 0 : i32
    %c0_i32_0 = arith.constant 0 : i32
    %c0_i32_1 = arith.constant 0 : i32
    return %c0_i32, %c0_i32_0 : i32, i32
  }
  func.func @transform_4(%arg0: i32, %arg1: i32) -> (i32, i32, i32) {
    %c0_i32 = arith.constant 0 : i32
    %c0_i32_0 = arith.constant 0 : i32
    return %arg0, %c0_i32, %arg1 : i32, i32, i32
  }
  func.func @transform_5(%arg0: i32, %arg1: i32) -> (i32, i32, i32) {
    %c0_i32 = arith.constant 0 : i32
    %c0_i32_0 = arith.constant 0 : i32
    %c0_i32_1 = arith.constant 0 : i32
    return %arg0, %c0_i32, %c0_i32_0 : i32, i32, i32
  }
  func.func @transform_6(%arg0: i32, %arg1: i32) -> (i32, i32, i32) {
    %c0_i32 = arith.constant 0 : i32
    %c0_i32_0 = arith.constant 0 : i32
    %c0_i32_1 = arith.constant 0 : i32
    return %arg0, %c0_i32, %c0_i32_0 : i32, i32, i32
  }
}

</mosaic_0001>

<bundles_post_ra>
// kernel: tdnn_forward.3
= control target key start
LH: loop header
LB: loop body
LE: loop exit
PB: predicated region body
PF: predicated region fallthrough
CT: control target
= control target key end

     0   :  { %8 = vsyncpa [#allocation3], 0  ;;  %s625_s0 = inlined_call_operand.vmem [shape: f32[2,16,128], index: 0, kind: input, shape index: {}]   ;;  %s626_s1 = inlined_call_operand.vmem [shape: f32[16,1], index: 1, kind: input, shape index: {}]   ;;  %s627_s2 = inlined_call_operand.vmem [shape: f32[16,1], index: 2, kind: input, shape index: {}]   ;;  %s628_s3 = inlined_call_operand.hbm [shape: f32[2,16,128], index: 3, kind: output, shape index: {}]  }
   0x1   :  { %10 = vsyncpa [#allocation3 + $0x1], 0  ;;  %s498_s12 = smov 0   ;;  %s500_s13 = smov 0  }
   0x2   :  { %s502_s14 = smov 0   ;;  %s504_s15 = smov 0  }
   0x3   :  { %s506_s16 = smov 0   ;;  %s508_s17 = smov 0  }
   0x4 LB: > { %s319_s18 = sadd.s32 4294967295, %s472_s17   ;;  %s320_s19 = sadd.s32 4294967294, %s472_s17   ;;  %s472_s17 = sphi %s508_s17, %s16_s17   ;;  %s468_s16 = sphi %s506_s16, %s635_s16   ;;  %s464_s15 = sphi %s504_s15, %s634_s15   ;;  %s460_s14 = sphi %s502_s14, %s633_s14   ;;  %s456_s13 = sphi %s500_s13, %s632_s13   ;;  %s452_s12 = sphi %s498_s12, %s631_s12  }
   0x5   : > { %s28_s20 = sadd.s32 1, %s468_s16  ;;  %s107_s21 = sadd.s32 1, %s460_s14 }
   0x6   : > { %p30_p0 = scmp.ge.s32.totalorder %s28_s20, 2  ;;  %p117_p1 = scmp.ne.s32.totalorder %s460_s14, %s456_s13 }
   0x7   : > { %p118_p2 = scmp.eq.s32.totalorder %s319_s18, 1  ;;  %p123_p3 = scmp.ne.s32.totalorder %s456_s13, %s452_s12 }
   0x8   : > { %s637_s20 = smov (%p30_p0, %s28_s20), 0  ;;  %p124_p5 = scmp.eq.s32.totalorder %s320_s19, 1 }
   0x9   : > { %p538_p4 = por %p118_p2, %p117_p1  ;;  %s102_s23 = ssub.s32 %s468_s16, %s637_s20 }
   0xa   : > { %p323_p6 = scmp.ge.s32.totalorder %s472_s17, 1  ;;  %p105_p7 = scmp.eq.s32.totalorder %s102_s23, 0 }
   0xb   : > { %p545_p8 = por %p124_p5, %p123_p3  ;;  %p159_p9 = scmp.lt.s32.totalorder %s472_s17, 3 }
   0xc   : > { %s551_s25 = scalar_select %p105_p7, %s460_s14, %s107_s21  }
   0xd   : > { %p160_p10 = pnand %p323_p6, %p159_p9 }
   0xe   : > { %v210_v0 = vld [vmem:[%s627_s2] sm:$0xff] (!%p160_p10)  ;;  %v474_v2 = vmov (!%p160_p10), 0   ;;  %v211_v3 = vld [vmem:[%s627_s2 + $0x8] sm:$0xff] (!%p160_p10)  ;;  %p186_p11 = scmp.lt.s32.totalorder (!%p160_p10), %s464_s15, 1  ;;  %s183_s18 = sand.u32 (!%p160_p10), 1, %s456_s13  }
   0xf   : > { %163 = sbr.rel (%p160_p10) target bundleno = 167 (0xa7), region = 32  ;;  %v196_v1 = vld [vmem:[%s626_s1] sm:$0xff] (!%p160_p10)  ;;  %393 = vset.pattern.permute.xlu1 (!%p160_p10), %v474_v2  ;;  %392 = vset.pattern.permute.xlu0 (!%p160_p10), %v474_v2  ;;  %v197_v4 = vld [vmem:[%s626_s1 + $0x8] sm:$0xff] (!%p160_p10)  ;;  %s324_s19 = sshll.u32 (!%p160_p10), %s183_s18, 4 }
  0x10   : > { %214 = vperm.xlu1 (!%p160_p10), %393, %v210_v0   ;;  %200 = vperm.xlu0 (!%p160_p10), %392, %v196_v1   ;;  %s185_s21 = scalar_lea.vmem (!%p160_p10), [#allocation2], %s324_s19  ;;  %s333_s26 = sshll.u32 (!%p160_p10), %s464_s15, 8 }
  0x11   : > { %s241_s23 = sshll.u32 (!%p160_p10), %s185_s21, 4  ;;  %s577_s29 = scalar_lea.hbm (!%p160_p10), %s628_s3, %s333_s26  ;;  %s572_s23 = int_to_ptr.vmem [resolvable:$true] %s241_s23 }
  0x12   : > { %s579_s30 = scalar_lea.sflag (!%p160_p10), [#allocation3], %s183_s18  ;;  %s394_s4 = scalar_lea.vmem (!%p160_p10), %s572_s23, 256 }
  0x13   : > { %p395_p12 = scmp.ne.s32.totalorder (!%p160_p10), %s572_s23, %s394_s4 }
  0x14   : > { %219 = vperm.xlu1 (!%p160_p10), %393, %v211_v3   ;;  %205 = vperm.xlu0 (!%p160_p10), %392, %v197_v4  }
  0x15   : > { %p396_p13 = pnand (!%p160_p10), %p395_p12, %p538_p4 }
  0x16   : > { %s187_s7 = scalar_select %p186_p11, %s464_s15, 1 }
  0x17   : > { %p397_p0 = pneg %p396_p13  ;;  %s475_s15 = smov [#allocation2]  }
  0x18   : > { %s332_s8 = sshll.u32 %s187_s7, 4  ;;  %s398_s5 = sshll.u32 %s475_s15, 4  ;;  %s399_s5 = int_to_ptr.vmem [resolvable:$false] %s398_s5 }
  0x19   : > { %s193_s11 = scalar_lea.vmem %s625_s0, %s332_s8  ;;  %s400_s6 = scalar_lea.vmem %s399_s5, 512 }
  0x1a   : > { %v194_v5 = vld [vmem:[%s193_s11] sm:$0xff]  ;;  %v195_v9 = vld [vmem:[%s193_s11 + $0x8] sm:$0xff]  ;;  %p401_p1 = scmp.lt.s32.totalorder %s572_s23, %s399_s5  ;;  %p402_p2 = scmp.lt.s32.totalorder %s400_s6, %s394_s4 }
  0x1c   : > { %p403_p3 = por %p402_p2, %p401_p1 }
  0x1e   : > { %p404_p5 = pnand %p403_p3, %p397_p0 }
  0x8f   : > { %v215_v6 = vpop.permute.xlu1 %214  ;;  %v201_v7 = vpop.permute.xlu0 %200 }
  0x90   : > { %v208_v8 = vmul.f32 %v201_v7, %v194_v5 }
  0x92   : > { %v222_v10 = vadd.f32 %v215_v6, %v208_v8 }
  0x93   : > { %v206_v11 = vpop.permute.xlu0 %205  ;;  %v220_v13 = vpop.permute.xlu1 %219 }
  0x94   : > { %224 = vst [vmem:[%s185_s21] sm:$0xff] %v222_v10  ;;  %v209_v12 = vmul.f32 %v206_v11, %v195_v9 }
  0x96   : > { %v223_v14 = vadd.f32 %v220_v13, %v209_v12 }
  0x98   : > { %225 = vst [vmem:[%s185_s21 + $0x8] sm:$0xff] %v223_v14 }
  0x99   : > { %407 = shalt.err (!%p404_p5)
}
  0x9a   : > { %s408_s7 = scalar_lea.hbm %s577_s29, 256  ;;  %s412_s10 = scalar_lea.hbm %s628_s3, 512 }
  0x9b   : > { %p409_p6 = scmp.ne.s32.totalorder %s577_s29, %s408_s7  ;;  %p413_p10 = scmp.lt.u32.totalorder %s577_s29, %s628_s3 }
  0x9c   : > { %p414_p11 = scmp.lt.u32.totalorder %s412_s10, %s408_s7  ;;  %p416_p13 = scmp.lt.u32.totalorder %s408_s7, %s577_s29 }
  0x9d   : > { %p410_p7 = pnand %p409_p6, %p538_p4 }
  0x9e   : > { %p415_p12 = por %p414_p11, %p413_p10 }
  0x9f   : > { %p411_p9 = pneg %p410_p7 }
  0xa0   : > { %p417_p0 = por %p416_p13, %p415_p12 }
  0xa2   : > { %p418_p1 = pnand %p417_p0, %p411_p9 }
  0xa4   : > { %421 = shalt.err (!%p418_p1)
}
  0xa5   : > { %s476_s19 = smov 128   ;;  %s477_s21 = smov 8  }
  0xa6   : > { %334 = dma.vmem_to_hbm [thread:$0]  (%p538_p4), %s572_s23, 256, %s577_s29, %s579_s30, %s476_s19, %s476_s19, %s477_s21  }
  0xa7 PF: > { %p340_p2 = scmp.ge.s32.totalorder %s472_s17, 2  ;;  %s256_s26 = sand.u32 1, %s452_s12  }
  0xa8   : > { %s257_s27 = scalar_lea.sflag [#allocation3], %s256_s26 }
  0xa9   : > { %p337_p3 = pnand %p340_p2, %p545_p8 }
  0xab   : > { %447 = dma.done.wait (!%p337_p3), %s257_s27, 256  }
  0xac   : > { %449 = vsyncadd (!%p337_p3), %s257_s27, 4294967040  ;;  %s16_s17 = sadd.s32 1, %s472_s17   ;;  %s631_s12 = smov %s456_s13 }
  0xad   : > { %p13_p5 = scmp.ge.s32.totalorder %s16_s17, 4   ;;  %s632_s13 = smov %s460_s14 }
  0xae   : > { %s633_s14 = smov %s551_s25  ;;  %s634_s15 = smov %s468_s16 }
  0xaf   : > { %s635_s16 = smov %s637_s20  ;;  %15 = sbr.rel (!%p13_p5) target bundleno = 4 (0x4), region = 67 }
  0xb6   :  { %262 = vsyncpa [#allocation3], 1 }
  0xb7   :  { %264 = vsyncpa [#allocation3 + $0x1], 1 }

// kernel: tdnn_forward.2
= control target key start
LH: loop header
LB: loop body
LE: loop exit
PB: predicated region body
PF: predicated region fallthrough
CT: control target
= control target key end

     0   :  { %s795_s21 = smov 0   ;;  %s797_s22 = smov 0   ;;  %s853_s0 = inlined_call_operand.vmem [shape: f32[2,8,256], index: 0, kind: input, shape index: {}, may-alias: {0,1}]   ;;  %s854_s1 = inlined_call_operand.vmem [shape: f32[2,8,256], index: 1, kind: input, shape index: {}, may-alias: {0,1}]   ;;  %s855_s2 = inlined_call_operand.vmem [shape: bf16[16,24], index: 2, kind: input, shape index: {}]   ;;  %s856_s3 = inlined_call_operand.vmem [shape: f32[16,1], index: 3, kind: input, shape index: {}]   ;;  %s857_s4 = inlined_call_operand.vmem [shape: f32[2,16,128], index: 4, kind: output, shape index: {0}]   ;;  %s858_s5 = inlined_call_operand.vmem [shape: f32[2,16,1], index: 5, kind: output, shape index: {1}]   ;;  %s859_s6 = inlined_call_operand.vmem [shape: f32[2,16,1], index: 6, kind: output, shape index: {2}]  }
   0x1   :  { %s799_s23 = smov 0  }
   0x2 LB: > { %s29_s24 = sadd.s32 1, %s749_s22  ;;  %p656_p0 = scmp.ge.s32.totalorder %s753_s23, 1  ;;  %s753_s23 = sphi %s799_s23, %s17_s23   ;;  %s749_s22 = sphi %s797_s22, %s861_s22   ;;  %s745_s21 = sphi %s795_s21, %s860_s21  }
   0x3   : > { %p31_p1 = scmp.ge.s32.totalorder %s29_s24, 2  ;;  %p255_p2 = scmp.lt.s32.totalorder %s753_s23, 3 }
   0x5   : > { %s863_s24 = smov (%p31_p1, %s29_s24), 0  ;;  %p256_p3 = pnand %p656_p0, %p255_p2 }
   0x6   : > { %p310_p4 = scmp.lt.s32.totalorder (!%p256_p3), %s745_s21, 1  ;;  %v755_v0 = vmov (!%p256_p3), 0.0   ;;  %vm756_vm0 = vmmov (!%p256_p3), 0   ;;  %s757_s9 = smov (!%p256_p3), 127   ;;  %v371_v4 = vld [vmem:[%s856_s3] sm:$0xff] (!%p256_p3)  ;;  %v758_v5 = vmov (!%p256_p3), 0   ;;  %v349_v7 = vlaneseq (!%p256_p3) }
   0x7   : > { %259 = sbr.rel (%p256_p3) target bundleno = 517 (0x205), region = 36  ;;  %681 = vmatprep.subr.bf16.mxu0 (!%p256_p3), %v755_v0  ;;  %685 = vmatprep.mubr.msk.bf16.mxu0 (!%p256_p3), %vm756_vm0, %v755_v0  ;;  %v372_v6 = vld [vmem:[%s856_s3 + $0x8] sm:$0xff] (!%p256_p3)  ;;  %s759_s14 = smov (!%p256_p3), 126   ;;  %vm392_vm3 = vcmask (!%p256_p3), 1043456   ;;  %v730_v20 = vld [vmem:[%s855_s2] sm:$0xff] (!%p256_p3)   ;;  %vm388_vm4 = vcmask (!%p256_p3), 195584  }
   0x8   : > { %728 = vset.pattern.permute.xlu1 (!%p256_p3), %v758_v5  ;;  %729 = vset.pattern.permute.xlu0 (!%p256_p3), %v758_v5  ;;  %v350_v8 = vand.u32 (!%p256_p3), 127, %v349_v7  ;;  %vm463_vm6 = vcmask (!%p256_p3), 7168  }
   0x9   : > { %375 = vperm.xlu1 (!%p256_p3), %728, %v371_v4  }
   0xa   : > { %vm355_vm1 = vcmp.lt.s32.totalorder (!%p256_p3), %v350_v8, 127  ;;  %vm363_vm2 = vcmp.lt.s32.totalorder (!%p256_p3), %v350_v8, 126  ;;  %vm444_vm5 = vcmp.lt.s32.totalorder (!%p256_p3), %v350_v8, 16 }
   0xd   : > { %380 = vperm.xlu1 (!%p256_p3), %728, %v372_v6  }
   0xe   : > { %s865_s21 = smov (!%p310_p4, %s745_s21), 1 }
   0xf   : > { %s813_s25 = sshll.u32 %s865_s21, 4 }
  0x10   : > { %s317_s28 = scalar_lea.vmem %s853_s0, %s813_s25  ;;  %s673_s29 = sadd.s32 8, %s813_s25 }
  0x11   : > { %s326_s8 = scalar_lea.vmem %s854_s1, %s673_s29  ;;  %v347_v1 = vld [vmem:[%s317_s28] sm:$0xff]  ;;  %s335_s19 = scalar_lea.vmem %s857_s4, %s813_s25 }
  0x12   : > { %v348_v2 = vld [vmem:[%s326_s8] sm:$0xff]  ;;  %s340_s26 = scalar_lea.vmem %s858_s5, %s813_s25  ;;  %s345_s29 = scalar_lea.vmem %s859_s6, %s813_s25 }
  0x13   : > { %v718_v3 = vpack.i.bf16 %v348_v2, %v347_v1 }
  0x15   : > { %719 = vrot.lane.b32.xlu0 %v718_v3, %s757_s9 }
  0x19   : > { %724 = vrot.lane.b32.xlu0 %v718_v3, %s759_s14 }
  0x87   : > { %v720_v9 = vpop.permute.xlu0 %719 }
  0x88   : > { %v722_v10 = vunpack.i.h.bf16 %v720_v9  ;;  %v721_v11 = vunpack.i.l.bf16 %v720_v9  ;;  %v376_v21 = vpop.permute.xlu1 %375 }
  0x8a   : > { %v358_v12 = vsel %vm355_vm1, %v721_v11, %v722_v10 }
  0x8b   : > { %v725_v13 = vpop.permute.xlu0 %724  ;;  %v369_v14 = vpack.c.bf16 %v358_v12, %v347_v1 }
  0x8c   : > { %v727_v15 = vunpack.i.h.bf16 %v725_v13  ;;  %v726_v16 = vunpack.i.l.bf16 %v725_v13  ;;  %v381_v25 = vpop.permute.xlu1 %380 }
  0x8d   : > { %682 = vmatpush3.bf16.msra.mxu0 %v369_v14 }
  0x8e   : > { %683 = vmatprep.subr.bf16.mxu0 %v755_v0  ;;  %v366_v17 = vsel %vm363_vm2, %v726_v16, %v727_v15 }
  0x8f   : > { %v370_v18 = vpack.c.bf16 %v366_v17, %v366_v17 }
  0x91   : > { %v394_v19 = vsel %vm392_vm3, %v370_v18, 0 }
  0x92   : > { %684 = vmatpush3.bf16.msra.mxu0 %v394_v19 }
  0x95   : > { %686 = vmatmul.mubr.msk.bf16.vlgmr.msra.gmra.mrb[0].mxu0 %vm388_vm4, %v730_v20 }
 0x168   : > { %v430_v22 = vpop.f32.mrb[0].mxu0 }
 0x169   : > { %v431_v23 = vadd.f32 %v430_v22, %v376_v21  ;;  %v687_v24 = vpop.f32.mrb[1].mxu0 }
 0x16a   : > { %v433_v26 = vpop.f32.mrb[2].mxu0 }
 0x16b   : > { %v437_v27 = vmax.f32 %v431_v23, 0.0  ;;  %v434_v28 = vadd.f32 %v433_v26, %v381_v25  ;;  %v688_v29 = vpop.f32.mrb[3].mxu0 }
 0x16d   : > { %439 = vst [vmem:[%s335_s19] sm:$0xff] %v437_v27  ;;  %v438_v30 = vmax.f32 %v434_v28, 0.0  ;;  %v447_v31 = vsel %vm444_vm5, %v437_v27, 0.0 }
 0x16e   : > { %449 = vadd.xlane.f32.xlu0 %v447_v31  ;;  %v453_v33 = vmul.f32 %v447_v31, %v447_v31 }
 0x16f   : > { %440 = vst [vmem:[%s335_s19 + $0x8] sm:$0xff] %v438_v30  ;;  %v448_v32 = vsel %vm444_vm5, %v438_v30, 0.0 }
 0x170   : > { %451 = vadd.xlane.f32.xlu1 %v448_v32  ;;  %v454_v34 = vmul.f32 %v448_v32, %v448_v32 }
 0x172   : > { %455 = vadd.xlane.f32.xlu0 %v453_v33 }
 0x176   : > { %457 = vadd.xlane.f32.xlu0 %v454_v34 }
 0x1fb   : > { %v450_v35 = vpop.xlane.xlu0 %449 }
 0x1fc   : > { %464 = vst.msk [vmem:[%s340_s26] sm:$0xff] %vm463_vm6, %v450_v35 }
 0x1fd   : > { %v452_v36 = vpop.xlane.xlu1 %451 }
 0x1fe   : > { %465 = vst.msk [vmem:[%s340_s26 + $0x8] sm:$0xff] %vm463_vm6, %v452_v36 }
 0x1ff   : > { %v456_v37 = vpop.xlane.xlu0 %455 }
 0x200   : > { %466 = vst.msk [vmem:[%s345_s29] sm:$0xff] %vm463_vm6, %v456_v37 }
 0x203   : > { %v458_v38 = vpop.xlane.xlu0 %457 }
 0x204   : > { %467 = vst.msk [vmem:[%s345_s29 + $0x8] sm:$0xff] %vm463_vm6, %v458_v38 }
 0x205 PF: > { %s17_s23 = sadd.s32 1, %s753_s23   ;;  %s860_s21 = smov %s749_s22 }
 0x206   : > { %p14_p5 = scmp.ge.s32.totalorder %s17_s23, 4   ;;  %s861_s22 = smov %s863_s24 }
 0x208   :  { %16 = sbr.rel (!%p14_p5) target bundleno = 2 (0x2), region = 101 }

</bundles_post_ra>
